<compile_context>
chip_gen: v6e
topology: v6e:2x2x1
jax: 0.10.0
libtpu: 0.0.40
codegen_flags: <defaults>
</compile_context>

<pallas_src>
import functools
import math

import jax
import jax.numpy as jnp
from jax.experimental import pallas as pl
from jax.experimental.pallas import tpu as pltpu


def _round_up(v, m):
    return (v + m - 1) // m * m


# ---------------------------------------------------------------------------
# Fused GCN aggregation kernel:  out_rows = sum_k A[rows, k-block] @ XW[k-block] (+b) (+ReLU)
# ---------------------------------------------------------------------------
def _gcn_spmm_kernel(a_ref, xw_ref, b_ref, o_ref, acc_ref, *, apply_relu):
    k = pl.program_id(1)

    @pl.when(k == 0)
    def _():
        acc_ref[...] = jnp.zeros_like(acc_ref)

    # (TM, TK) bf16 @ (TK, Fout) bf16 -> f32 accumulation on the MXU.
    acc_ref[...] += jnp.dot(a_ref[...], xw_ref[...],
                            preferred_element_type=jnp.float32)

    @pl.when(k == pl.num_programs(1) - 1)
    def _():
        y = acc_ref[...] + b_ref[...]
        if apply_relu:
            y = jnp.maximum(y, 0.0)
        o_ref[...] = y.astype(o_ref.dtype)


def _gcn_spmm(a_hat, xw, b, *, apply_relu, out_dtype, block_rows=256, block_k=512):
    """a_hat: (Npad, Npad) bf16, xw: (Npad, Fout) bf16, b: (1, Fout) f32. All 128-aligned."""
    n_pad = a_hat.shape[0]
    f_out = xw.shape[1]
    tm = min(block_rows, n_pad)
    tk = min(block_k, n_pad)
    assert n_pad % tm == 0 and n_pad % tk == 0

    kernel = functools.partial(_gcn_spmm_kernel, apply_relu=apply_relu)
    cost = pl.CostEstimate(
        flops=2 * n_pad * n_pad * f_out,
        transcendentals=0,
        bytes_accessed=(n_pad * n_pad * jnp.dtype(a_hat.dtype).itemsize
                        + n_pad * f_out * jnp.dtype(xw.dtype).itemsize
                        + n_pad * f_out * jnp.dtype(out_dtype).itemsize
                        + f_out * 4),
    )

    return pl.pallas_call(
        kernel,
        out_shape=jax.ShapeDtypeStruct((n_pad, f_out), out_dtype),
        grid_spec=pltpu.PrefetchScalarGridSpec(
            num_scalar_prefetch=0,
            grid=(n_pad // tm, n_pad // tk),            # rows (parallel), K (reduction, last)
            in_specs=[
                pl.BlockSpec((tm, tk), lambda i, k: (i, k)),     # A_hat tile
                pl.BlockSpec((tk, f_out), lambda i, k: (k, 0)),  # XW K-slab
                pl.BlockSpec((1, f_out), lambda i, k: (0, 0)),   # bias (resident)
            ],
            out_specs=pl.BlockSpec((tm, f_out), lambda i, k: (i, 0)),
            scratch_shapes=[pltpu.VMEM((tm, f_out), jnp.float32)],
        ),
        compiler_params=pltpu.CompilerParams(
            dimension_semantics=("parallel", "arbitrary"),
            vmem_limit_bytes=32 * 1024 * 1024,
        ),
        cost_estimate=cost,
    )(a_hat, xw, b)


# ---------------------------------------------------------------------------
# Graph preprocessing (plain JAX): dense GCN-normalized adjacency
# ---------------------------------------------------------------------------
def build_gcn_adj(ei, ew, num_nodes):
    """A_hat[dst, src] = deg^-1/2[dst] * w * deg^-1/2[src], with remaining self-loops (w=1)."""
    src = ei[0]
    dst = ei[1]
    w = jnp.ones(src.shape, jnp.float32) if ew is None else ew.astype(jnp.float32)
    a = jnp.zeros((num_nodes, num_nodes), jnp.float32).at[dst, src].add(w)
    # add_remaining_self_loops(fill_value=1.0): only for nodes without an existing self loop.
    has_loop = jnp.diag(a) != 0.0
    a = a + jnp.diag(jnp.where(has_loop, 0.0, 1.0))
    deg = a.sum(axis=1)
    dinv = jnp.where(deg > 0, jax.lax.rsqrt(deg), 0.0)
    return dinv[:, None] * a * dinv[None, :]


# ---------------------------------------------------------------------------
# GAE forward
# ---------------------------------------------------------------------------
def gae_forward(x, ei, params, ew=None, *, block_rows=256, block_k=512):
    """x: (N, F) f32, ei: (2, E) int32.  Returns (N, embed_dim) f32."""
    n = x.shape[0]
    h = params["w1"].shape[1]
    o = params["w2"].shape[1]

    # TODO(synk): DropEdge(0.8) is a training-only stochastic edge mask -> identity in eval.
    a_hat = build_gcn_adj(ei, ew, n)

    # Pad the node dim so both tile sizes divide it; feature dims to lane-dense 128.
    n_pad = _round_up(n, 128)
    tm = min(block_rows, n_pad)
    tk = min(block_k, n_pad)
    n_pad = _round_up(n_pad, math.lcm(tm, tk))
    h_pad = _round_up(h, 128)
    o_pad = _round_up(o, 128)

    a_bf16 = jnp.pad(a_hat, ((0, n_pad - n), (0, n_pad - n))).astype(jnp.bfloat16)

    # Layer 1: precompute XW once (tiny dot), kernel does the N x N aggregation + bias + ReLU.
    xw1 = jnp.dot(x, params["w1"], preferred_element_type=jnp.float32)
    xw1 = jnp.pad(xw1, ((0, n_pad - n), (0, h_pad - h))).astype(jnp.bfloat16)
    b1 = jnp.pad(params["b1"].reshape(1, -1), ((0, 0), (0, h_pad - h)))
    # Dropout(0.25) is an eval-mode identity.
    h1 = _gcn_spmm(a_bf16, xw1, b1, apply_relu=True, out_dtype=jnp.bfloat16,
                   block_rows=tm, block_k=tk)

    # Layer 2: padded rows of h1 equal relu(b1) but are killed by a_hat's zero padded columns;
    # padded columns of h1 are exactly zero, so the zero-padded w2 rows contribute nothing.
    w2_p = jnp.pad(params["w2"], ((0, h_pad - h), (0, o_pad - o)))
    xw2 = jnp.dot(h1, w2_p, preferred_element_type=jnp.float32).astype(jnp.bfloat16)
    b2 = jnp.pad(params["b2"].reshape(1, -1), ((0, 0), (0, o_pad - o)))
    out = _gcn_spmm(a_bf16, xw2, b2, apply_relu=False, out_dtype=jnp.float32,
                    block_rows=tm, block_k=tk)
    return out[:n, :o]


# ---------------------------------------------------------------------------
# Params + pure-JAX reference
# ---------------------------------------------------------------------------
def init_params(key, feat_dim, hidden_dim, embed_dim):
    k = jax.random.split(key, 4)

    def glorot(k_, shape):
        lim = jnp.sqrt(6.0 / (shape[0] + shape[1]))
        return jax.random.uniform(k_, shape, jnp.float32, -lim, lim)

    return {
        "w1": glorot(k[0], (feat_dim, hidden_dim)),            # stored as (in, out)
        "b1": 0.1 * jax.random.normal(k[1], (hidden_dim,), jnp.float32),
        "w2": glorot(k[2], (hidden_dim, embed_dim)),
        "b2": 0.1 * jax.random.normal(k[3], (embed_dim,), jnp.float32),
    }


def _reference_gae(x, ei, params, ew=None):
    """Dense f32 reference matching PyG GCNConv math: A_hat @ (X @ W) + b."""
    a_hat = build_gcn_adj(ei, ew, x.shape[0])
    h1 = jnp.maximum(a_hat @ (x @ params["w1"]) + params["b1"][None, :], 0.0)
    return a_hat @ (h1 @ params["w2"]) + params["b2"][None, :]


if __name__ == "__main__":
    N, FEAT, HID, EMB, E = 64, 16, 32, 16, 256

    key = jax.random.PRNGKey(0)
    k_x, k_s, k_d, k_p = jax.random.split(key, 4)
    x = jax.random.normal(k_x, (N, FEAT), jnp.float32)
    src = jax.random.randint(k_s, (E,), 0, N, jnp.int32)
    dst = jax.random.randint(k_d, (E,), 0, N, jnp.int32)
    ei = jnp.stack([src, dst])
    params = init_params(k_p, FEAT, HID, EMB)

    out = jax.block_until_ready(gae_forward(x, ei, params))
    ref = _reference_gae(x, ei, params)

    assert out.shape == (N, EMB)
    # bf16 operands (f32 accumulation) -> relative-to-max tolerance.
    err = float(jnp.max(jnp.abs(out - ref)))
    tol = 3e-2 * float(jnp.max(jnp.abs(ref))) + 1e-3
    assert err <= tol, (err, tol)

    print("KERNEL_OK")
</pallas_src>

<mosaic_0001>
module attributes {stable_mosaic.version = 11 : i64} {
  func.func @_gcn_spmm_kernel(%arg0: i32, %arg1: i32, %arg2: memref<128x128xbf16, #tpu.memory_space<vmem>>, %arg3: memref<128x128xbf16, #tpu.memory_space<vmem>>, %arg4: memref<1x128xf32, #tpu.memory_space<vmem>>, %arg5: memref<128x128xbf16, #tpu.memory_space<vmem>>, %arg6: memref<128x128xf32, #tpu.memory_space<vmem>>) attributes {dimension_semantics = [#tpu.dimension_semantics<parallel>, #tpu.dimension_semantics<arbitrary>], iteration_bounds = array<i64: 1, 1>, scalar_prefetch = 0 : i64, scratch_operands = 1 : i64, tpu.core_type = #tpu.core_type<tc>, window_params = [{transform_indices = @transform_0, window_bounds = array<i64: 128, 128>}, {transform_indices = @transform_1, window_bounds = array<i64: 128, 128>}, {pipeline_mode = #tpu.pipeline_mode<synchronous>, transform_indices = @transform_2, window_bounds = array<i64: 1, 128>}, {transform_indices = @transform_3, window_bounds = array<i64: 128, 128>}]} {
    %c0_i32 = arith.constant 0 : i32
    %0 = arith.cmpi eq, %arg1, %c0_i32 : i32
    %1 = arith.extui %0 : i1 to i32
    %c0_i32_0 = arith.constant 0 : i32
    %2 = arith.cmpi ne, %1, %c0_i32_0 : i32
    scf.if %2 {
      %cst_10 = arith.constant 0.000000e+00 : f32
      %12 = vector.broadcast %cst_10 : f32 to vector<128x128xf32>
      %c0_11 = arith.constant 0 : index
      %c0_12 = arith.constant 0 : index
      %13 = vector.load %arg6[%c0_11, %c0_12] : memref<128x128xf32, #tpu.memory_space<vmem>>, vector<128x128xf32>
      tpu.vector_store %arg6[%c0_11, %c0_12], %12 {strides = array<i32>} : memref<128x128xf32, #tpu.memory_space<vmem>>, vector<128x128xf32>,
    } else {
    }
    %c0 = arith.constant 0 : index
    %c0_1 = arith.constant 0 : index
    %3 = vector.load %arg6[%c0, %c0_1] : memref<128x128xf32, #tpu.memory_space<vmem>>, vector<128x128xf32>
    %c0_2 = arith.constant 0 : index
    %c0_3 = arith.constant 0 : index
    %4 = vector.load %arg2[%c0_2, %c0_3] : memref<128x128xbf16, #tpu.memory_space<vmem>>, vector<128x128xbf16>
    %c0_4 = arith.constant 0 : index
    %c0_5 = arith.constant 0 : index
    %5 = vector.load %arg3[%c0_4, %c0_5] : memref<128x128xbf16, #tpu.memory_space<vmem>>, vector<128x128xbf16>
    %cst = arith.constant dense<0.000000e+00> : vector<128x128xf32>
    %6 = tpu.matmul %4, %5, %cst {dimension_numbers = #tpu.dot_dimension_numbers<[1], [0], [0], [1], [0, 0, 1, 1], [], []>} : vector<128x128xbf16>, vector<128x128xbf16>, vector<128x128xf32> -> vector<128x128xf32>
    %7 = arith.addf %3, %6 : vector<128x128xf32>
    %c0_6 = arith.constant 0 : index
    %c0_7 = arith.constant 0 : index
    %8 = vector.load %arg6[%c0_6, %c0_7] : memref<128x128xf32, #tpu.memory_space<vmem>>, vector<128x128xf32>
    tpu.vector_store %arg6[%c0_6, %c0_7], %7 {strides = array<i32>} : memref<128x128xf32, #tpu.memory_space<vmem>>, vector<128x128xf32>,
    %c0_i32_8 = arith.constant 0 : i32
    %9 = arith.cmpi eq, %arg1, %c0_i32_8 : i32
    %10 = arith.extui %9 : i1 to i32
    %c0_i32_9 = arith.constant 0 : i32
    %11 = arith.cmpi ne, %10, %c0_i32_9 : i32
    scf.if %11 {
      %c0_10 = arith.constant 0 : index
      %c0_11 = arith.constant 0 : index
      %12 = vector.load %arg6[%c0_10, %c0_11] : memref<128x128xf32, #tpu.memory_space<vmem>>, vector<128x128xf32>
      %c0_12 = arith.constant 0 : index
      %c0_13 = arith.constant 0 : index
      %13 = vector.load %arg4[%c0_12, %c0_13] : memref<1x128xf32, #tpu.memory_space<vmem>>, vector<1x128xf32>
      %14 = vector.broadcast %13 : vector<1x128xf32> to vector<128x128xf32>
      %15 = arith.addf %12, %14 : vector<128x128xf32>
      %cst_14 = arith.constant 0.000000e+00 : f32
      %16 = vector.broadcast %cst_14 : f32 to vector<128x128xf32>
      %17 = arith.maximumf %15, %16 : vector<128x128xf32>
      %18 = arith.truncf %17 : vector<128x128xf32> to vector<128x128xbf16>
      %c0_15 = arith.constant 0 : index
      %c0_16 = arith.constant 0 : index
      %19 = vector.load %arg5[%c0_15, %c0_16] : memref<128x128xbf16, #tpu.memory_space<vmem>>, vector<128x128xbf16>
      tpu.vector_store %arg5[%c0_15, %c0_16], %18 {strides = array<i32>} : memref<128x128xbf16, #tpu.memory_space<vmem>>, vector<128x128xbf16>,
    } else {
    }
    return
  }
  func.func @transform_0(%arg0: i32, %arg1: i32) -> (i32, i32) {
    %c0_i32 = arith.constant 0 : i32
    return %arg0, %arg1 : i32, i32
  }
  func.func @transform_1(%arg0: i32, %arg1: i32) -> (i32, i32) {
    %c0_i32 = arith.constant 0 : i32
    %c0_i32_0 = arith.constant 0 : i32
    return %arg1, %c0_i32 : i32, i32
  }
  func.func @transform_2(%arg0: i32, %arg1: i32) -> (i32, i32) {
    %c0_i32 = arith.constant 0 : i32
    %c0_i32_0 = arith.constant 0 : i32
    %c0_i32_1 = arith.constant 0 : i32
    return %c0_i32, %c0_i32_0 : i32, i32
  }
  func.func @transform_3(%arg0: i32, %arg1: i32) -> (i32, i32) {
    %c0_i32 = arith.constant 0 : i32
    %c0_i32_0 = arith.constant 0 : i32
    return %arg0, %c0_i32 : i32, i32
  }
}

</mosaic_0001>

<bundles_post_ra>
// kernel: tpu_custom_call.1
= control target key start
LH: loop header
LB: loop body
LE: loop exit
PB: predicated region body
PF: predicated region fallthrough
CT: control target
= control target key end

     0   :  { %8 = vsyncpa [#allocation4], 0  ;;  %s786_s0 = inlined_call_operand.hbm [shape: bf16[128,128], index: 0, kind: input, shape index: {}]   ;;  %s787_s1 = inlined_call_operand.hbm [shape: bf16[128,128], index: 1, kind: input, shape index: {}]   ;;  %s788_s2 = inlined_call_operand.vmem [shape: f32[1,128], index: 2, kind: input, shape index: {}]   ;;  %s789_s3 = inlined_call_operand.hbm [shape: bf16[128,128], index: 3, kind: output, shape index: {}]  }
   0x1   :  { %9 = vsyncpa [#allocation7], 0 }
   0x2   :  { %10 = vsyncpa [#allocation5], 0  ;;  %s740_s12 = smov [#allocation3]  }
   0x3   :  { %s16_s13 = sshll.u32 %s740_s12, 4  ;;  %s17_s13 = int_to_ptr.vmem [resolvable:$true] %s16_s13 }
   0x4   :  { %s682_s14 = scalar_lea.vmem %s17_s13, 1024  ;;  %p687_p1 = scmp.lt.s32.totalorder %s17_s13, %s17_s13 }
   0x5   :  { %p683_p0 = scmp.ne.s32.totalorder %s17_s13, %s682_s14  ;;  %p688_p2 = scmp.lt.s32.totalorder %s682_s14, %s682_s14 }
   0x7   :  { %p689_p3 = por %p688_p2, %p687_p1 }
   0x9   :  { %p690_p4 = pnand %p689_p3, %p683_p0 }
   0xb   :  { %693 = shalt.err (!%p690_p4)
}
   0xc   :  { %s741_s15 = smov 64   ;;  %s742_s16 = smov 4  }
   0xd   :  { %22 = dma.hbm_to_vmem [thread:$0]  %s786_s0, 1024, %s17_s13, [#allocation4], %s741_s15, %s741_s15, %s742_s16  }
   0xe   :  { %s743_s19 = smov [#allocation6]  }
   0xf   :  { %s28_s20 = sshll.u32 %s743_s19, 4  ;;  %s29_s20 = int_to_ptr.vmem [resolvable:$true] %s28_s20 }
  0x10   :  { %s702_s21 = scalar_lea.vmem %s29_s20, 1024  ;;  %p707_p6 = scmp.lt.s32.totalorder %s29_s20, %s29_s20 }
  0x11   :  { %p703_p5 = scmp.ne.s32.totalorder %s29_s20, %s702_s21  ;;  %p708_p7 = scmp.lt.s32.totalorder %s702_s21, %s702_s21 }
  0x13   :  { %p709_p8 = por %p708_p7, %p707_p6 }
  0x15   :  { %p710_p9 = pnand %p709_p8, %p703_p5 }
  0x17   :  { %713 = shalt.err (!%p710_p9)
}
  0x18   :  { %34 = dma.hbm_to_vmem [thread:$0]  %s787_s1, 1024, %s29_s20, [#allocation7], %s741_s15, %s741_s15, %s742_s16  }
  0x19   :  { %734 = dma.done.wait [#allocation4], 1024  }
  0x1a   :  { %735 = vsyncadd [#allocation4], 4294966272 }
  0x1b   :  { %736 = dma.done.wait [#allocation7], 1024  }
  0x1c   :  { %737 = vsyncadd [#allocation7], 4294966272  ;;  %v658_v0 = vld [vmem:[#allocation6 + $0x38] sm:$0xff]   ;;  %v659_v1 = vld [vmem:[#allocation6 + $0x30] sm:$0xff]  }
  0x1d   :  { %605 = vmatprep.subr.bf16.mxu0 %v658_v0  ;;  %637 = vmatprep.subr.bf16.mxu1 %v658_v0  ;;  %v660_v2 = vld [vmem:[#allocation6 + $0x28] sm:$0xff]   ;;  %v661_v3 = vld [vmem:[#allocation6 + $0x20] sm:$0xff]   ;;  %v662_v6 = vld [vmem:[#allocation6 + $0x18] sm:$0xff]  }
  0x1e   :  { %606 = vmatpush3.bf16.msra.mxu0 %v658_v0  ;;  %645 = vmatpush3.bf16.msra.mxu1 %v658_v0  ;;  %v666_v4 = vld [vmem:[#allocation3] sm:$0xff]   ;;  %v663_v7 = vld [vmem:[#allocation6 + $0x10] sm:$0xff]   ;;  %v664_v8 = vld [vmem:[#allocation6 + $0x8] sm:$0xff]  }
  0x1f   :  { %607 = vmatprep.subr.bf16.mxu0 %v659_v1  ;;  %638 = vmatprep.subr.bf16.mxu1 %v659_v1  ;;  %v667_v5 = vld [vmem:[#allocation3 + $0x20] sm:$0xff]   ;;  %v668_v10 = vld [vmem:[#allocation3 + $0x8] sm:$0xff]   ;;  %v670_v12 = vld [vmem:[#allocation3 + $0x10] sm:$0xff]  }
  0x20   :  { %621 = vmatprep.mubr.bf16.mxu0 %v666_v4  ;;  %629 = vmatprep.mubr.bf16.mxu1 %v667_v5  ;;  %v665_v9 = vld [vmem:[#allocation6] sm:$0xff]   ;;  %v669_v11 = vld [vmem:[#allocation3 + $0x28] sm:$0xff]   ;;  %v671_v13 = vld [vmem:[#allocation3 + $0x30] sm:$0xff]  }
  0x21   :  { %v672_v14 = vld [vmem:[#allocation3 + $0x18] sm:$0xff]   ;;  %v509_v16 = vld [vmem:[%s788_s2] ss:$0 sm:$0xff]  ;;  %s744_s2 = smov [#allocation8]  }
  0x22   :  { %608 = vmatpush3.bf16.msra.mxu0 %v659_v1  ;;  %646 = vmatpush3.bf16.msra.mxu1 %v659_v1  ;;  %v673_v15 = vld [vmem:[#allocation3 + $0x38] sm:$0xff]   ;;  %s480_s24 = sshll.u32 %s744_s2, 4  ;;  %s481_s24 = int_to_ptr.vmem [resolvable:$true] %s480_s24 }
  0x23   :  { %609 = vmatprep.subr.bf16.mxu0 %v660_v2  ;;  %639 = vmatprep.subr.bf16.mxu1 %v660_v2  ;;  %s714_s25 = scalar_lea.vmem %s481_s24, 1024  ;;  %p719_p11 = scmp.lt.s32.totalorder %s481_s24, %s481_s24 }
  0x24   :  { %p715_p10 = scmp.ne.s32.totalorder %s481_s24, %s714_s25  ;;  %p720_p12 = scmp.lt.s32.totalorder %s714_s25, %s714_s25 }
  0x26   :  { %610 = vmatpush3.bf16.msra.mxu0 %v660_v2  ;;  %647 = vmatpush3.bf16.msra.mxu1 %v660_v2  ;;  %p721_p13 = por %p720_p12, %p719_p11 }
  0x27   :  { %611 = vmatprep.subr.bf16.mxu0 %v661_v3  ;;  %640 = vmatprep.subr.bf16.mxu1 %v661_v3 }
  0x28   :  { %p722_p0 = pnand %p721_p13, %p715_p10 }
  0x2a   :  { %612 = vmatpush3.bf16.msra.mxu0 %v661_v3  ;;  %648 = vmatpush3.bf16.msra.mxu1 %v661_v3 }
  0x2b   :  { %613 = vmatprep.subr.bf16.mxu0 %v662_v6  ;;  %641 = vmatprep.subr.bf16.mxu1 %v662_v6 }
  0x2e   :  { %614 = vmatpush3.bf16.msra.mxu0 %v662_v6  ;;  %649 = vmatpush3.bf16.msra.mxu1 %v662_v6 }
  0x2f   :  { %615 = vmatprep.subr.bf16.mxu0 %v663_v7  ;;  %642 = vmatprep.subr.bf16.mxu1 %v663_v7 }
  0x32   :  { %616 = vmatpush3.bf16.msra.mxu0 %v663_v7  ;;  %650 = vmatpush3.bf16.msra.mxu1 %v663_v7 }
  0x33   :  { %617 = vmatprep.subr.bf16.mxu0 %v664_v8  ;;  %643 = vmatprep.subr.bf16.mxu1 %v664_v8 }
  0x36   :  { %618 = vmatpush3.bf16.msra.mxu0 %v664_v8  ;;  %651 = vmatpush3.bf16.msra.mxu1 %v664_v8 }
  0x37   :  { %619 = vmatprep.subr.bf16.mxu0 %v665_v9  ;;  %644 = vmatprep.subr.bf16.mxu1 %v665_v9 }
  0x3a   :  { %620 = vmatpush3.bf16.msra.mxu0 %v665_v9  ;;  %652 = vmatpush3.bf16.msra.mxu1 %v665_v9 }
  0x3d   :  { %622 = vmatmul.mubr.bf16.vlgmr.msra.gmra.mxu0 %v668_v10  ;;  %630 = vmatmul.mubr.bf16.vlgmr.msra.gmra.mxu1 %v669_v11 }
  0x3e   :  { %625 = vmatprep.mubr.bf16.mxu0 %v670_v12  ;;  %633 = vmatprep.mubr.bf16.mxu1 %v671_v13 }
  0x45   :  { %626 = vmatmul.mubr.bf16.gmra.mxu0 %v672_v14  ;;  %634 = vmatmul.mubr.bf16.gmra.mxu1 %v673_v15 }
  0xfd   :  { %v623_v17 = vpop.f32.mrf.mxu0  ;;  %v631_v18 = vpop.f32.mrf.mxu1 }
  0xfe   :  { %v365_v19 = vadd.f32 %v623_v17, %v509_v16  ;;  %v373_v20 = vadd.f32 %v631_v18, %v509_v16 }
  0xff   :  { %v242_v21 = vpop.f32.mrf.mxu0  ;;  %v274_v22 = vpop.f32.mrf.mxu1 }
 0x100   :  { %v363_v23 = vadd.f32 %v509_v16, %v242_v21  ;;  %v371_v24 = vadd.f32 %v509_v16, %v274_v22  ;;  %v381_v29 = vmax.f32 %v365_v19, 0.0  ;;  %v389_v30 = vmax.f32 %v373_v20, 0.0 }
 0x101   :  { %v624_v25 = vpop.f32.mrf.mxu0  ;;  %v632_v26 = vpop.f32.mrf.mxu1 }
 0x102   :  { %v366_v27 = vadd.f32 %v624_v25, %v509_v16  ;;  %v374_v28 = vadd.f32 %v632_v26, %v509_v16  ;;  %v379_v37 = vmax.f32 %v363_v23, 0.0  ;;  %v387_v38 = vmax.f32 %v371_v24, 0.0 }
 0x103   :  { %v245_v31 = vpop.f32.mrf.mxu0  ;;  %v277_v32 = vpop.f32.mrf.mxu1 }
 0x104   :  { %v382_v33 = vmax.f32 %v366_v27, 0.0  ;;  %v390_v34 = vmax.f32 %v374_v28, 0.0  ;;  %v364_v35 = vadd.f32 %v509_v16, %v245_v31  ;;  %v372_v36 = vadd.f32 %v509_v16, %v277_v32 }
 0x105   :  { %v627_v39 = vpop.f32.mrf.mxu0  ;;  %v635_v40 = vpop.f32.mrf.mxu1 }
 0x106   :  { %v550_v41 = vpack.c.bf16 %v382_v33, %v381_v29  ;;  %v570_v42 = vpack.c.bf16 %v390_v34, %v389_v30  ;;  %v380_v43 = vmax.f32 %v364_v35, 0.0  ;;  %v388_v44 = vmax.f32 %v372_v36, 0.0 }
 0x107   :  { %v369_v45 = vadd.f32 %v627_v39, %v509_v16  ;;  %v377_v46 = vadd.f32 %v635_v40, %v509_v16  ;;  %v258_v47 = vpop.f32.mrf.mxu0  ;;  %v290_v48 = vpop.f32.mrf.mxu1 }
 0x108   :  { %582 = vst [vmem:[#allocation8 + $0x8] sm:$0xff] %v550_v41   ;;  %586 = vst [vmem:[#allocation8 + $0x28] sm:$0xff] %v570_v42   ;;  %v545_v49 = vpack.c.bf16 %v380_v43, %v379_v37  ;;  %v565_v50 = vpack.c.bf16 %v388_v44, %v387_v38  ;;  %v367_v51 = vadd.f32 %v509_v16, %v258_v47 }
 0x109   :  { %v375_v52 = vadd.f32 %v509_v16, %v290_v48  ;;  %v628_v53 = vpop.f32.mrf.mxu0  ;;  %v636_v54 = vpop.f32.mrf.mxu1  ;;  %v385_v57 = vmax.f32 %v369_v45, 0.0  ;;  %v393_v58 = vmax.f32 %v377_v46, 0.0 }
 0x10a   :  { %546 = vst [vmem:[#allocation8] sm:$0xff] %v545_v49   ;;  %585 = vst [vmem:[#allocation8 + $0x20] sm:$0xff] %v565_v50   ;;  %v370_v55 = vadd.f32 %v628_v53, %v509_v16  ;;  %v378_v56 = vadd.f32 %v636_v54, %v509_v16  ;;  %v383_v1 = vmax.f32 %v367_v51, 0.0 }
 0x10b   :  { %v261_v59 = vpop.f32.mrf.mxu0  ;;  %v293_v60 = vpop.f32.mrf.mxu1  ;;  %v391_v2 = vmax.f32 %v375_v52, 0.0 }
 0x10c   :  { %v386_v61 = vmax.f32 %v370_v55, 0.0  ;;  %v394_v62 = vmax.f32 %v378_v56, 0.0  ;;  %v368_v63 = vadd.f32 %v509_v16, %v261_v59  ;;  %v376_v0 = vadd.f32 %v509_v16, %v293_v60 }
 0x10e   :  { %v560_v3 = vpack.c.bf16 %v386_v61, %v385_v57  ;;  %v580_v4 = vpack.c.bf16 %v394_v62, %v393_v58  ;;  %v384_v5 = vmax.f32 %v368_v63, 0.0  ;;  %v392_v6 = vmax.f32 %v376_v0, 0.0 }
 0x110   :  { %584 = vst [vmem:[#allocation8 + $0x18] sm:$0xff] %v560_v3   ;;  %588 = vst [vmem:[#allocation8 + $0x38] sm:$0xff] %v580_v4   ;;  %v555_v7 = vpack.c.bf16 %v384_v5, %v383_v1  ;;  %v575_v8 = vpack.c.bf16 %v392_v6, %v391_v2 }
 0x112   :  { %583 = vst [vmem:[#allocation8 + $0x10] sm:$0xff] %v555_v7   ;;  %587 = vst [vmem:[#allocation8 + $0x30] sm:$0xff] %v575_v8  }
 0x113   :  { %725 = shalt.err (!%p722_p0)
}
 0x114   :  { %486 = dma.vmem_to_hbm [thread:$0]  %s481_s24, 1024, %s789_s3, [#allocation5], %s741_s15, %s741_s15, %s742_s16  }
 0x115   :  { %738 = dma.done.wait [#allocation5], 1024  }
 0x116   :  { %739 = vsyncadd [#allocation5], 4294966272 }
 0x117   :  { %490 = vsyncpa [#allocation4], 1 }
 0x118   :  { %491 = vsyncpa [#allocation7], 1 }
 0x119   :  { %492 = vsyncpa [#allocation5], 1 }

</bundles_post_ra>
